<compile_context>
chip_gen: v7x
topology: tpu7x:2x2x1
jax: 0.10.0
libtpu: 0.0.40
codegen_flags: <defaults>
</compile_context>

<pallas_src>
import functools
import math

import jax
import jax.numpy as jnp
from jax.experimental import pallas as pl
from jax.experimental.pallas import tpu as pltpu


# ----------------------------------------------------------------------------
# Kernel: global-avg-pool -> k-tap channel conv (rolled FMAs) -> sigmoid -> scale
#   x block : (Bt, C, HW)   channels on sublanes, pixels on lanes (full C / HW dims)
#   w       : (k,) fp32 in SMEM (just the conv taps)
# ----------------------------------------------------------------------------
def channel_attention_kernel(inv_hw, pad, x_ref, w_ref, o_ref):
    xb = x_ref[...]                                               # (Bt, C, HW), I/O dtype
    C = x_ref.shape[1]

    # Global average pool over the spatial (lane) axis, accumulated in fp32.
    mean = jnp.sum(xb.astype(jnp.float32), axis=-1, keepdims=True) * inv_hw   # (Bt, C, 1)

    # k-tap Conv1d along channels: k sublane-shifted multiply-adds with zero padding
    # at the channel boundaries (mask on wrapped values).
    ci = jax.lax.broadcasted_iota(jnp.int32, mean.shape, 1)      # channel index
    y = w_ref[pad] * mean                                        # center tap (d = 0)
    for d in range(-pad, pad + 1):
        if d == 0:
            continue
        shifted = pltpu.roll(mean, shift=(-d) % C, axis=1)       # shifted[c] = mean[c + d]
        valid = (ci + d >= 0) & (ci + d < C)                     # Conv1d zero padding
        y = y + w_ref[pad + d] * jnp.where(valid, shifted, 0.0)

    scale = jax.nn.sigmoid(y)                                    # (Bt, C, 1) fp32
    # Per-channel scale broadcast over all lanes; single store of the block.
    o_ref[...] = (xb * scale).astype(o_ref.dtype)


def channel_attention_pallas(x, conv_w, *, vmem_block_budget=28 << 20):
    """x: (B, C, H, W) NCHW (fp32 or bf16). conv_w: (1, 1, k) Conv1d weight (no bias)."""
    B, C, H, W = x.shape
    HW = H * W
    k = int(conv_w.shape[-1])
    pad = (k - 1) // 2
    itemsize = jnp.dtype(x.dtype).itemsize

    x3 = x.reshape(B, C, HW)                     # contiguous reshape: no HBM copy
    w = conv_w.reshape(-1).astype(jnp.float32)   # (k,) taps -> SMEM

    # ---- choose Bt (batch rows per grid step) ----------------------------------
    # 2 double-buffered input blocks + 2 double-buffered output blocks per step.
    per_b_bytes = C * HW * itemsize
    max_bt = max(1, int(vmem_block_budget // (4 * per_b_bytes)))
    divisors = [d for d in range(1, B + 1) if B % d == 0]
    cand = [d for d in divisors if d <= max_bt and (B // d) >= 2]   # keep >=2 steps
    if not cand:
        cand = [d for d in divisors if d <= max_bt] or [1]
    Bt = max(cand)
    grid = (B // Bt,)

    block_bytes = Bt * per_b_bytes
    vmem_limit = int(max(4 * block_bytes + (2 << 20), 32 << 20))

    kernel = functools.partial(channel_attention_kernel, 1.0 / HW, pad)
    out = pl.pallas_call(
        kernel,
        out_shape=jax.ShapeDtypeStruct((B, C, HW), x.dtype),
        grid=grid,
        in_specs=[
            # Full (C, HW) dims per block -> no padding / slicing of x in the wrapper.
            pl.BlockSpec((Bt, C, HW), lambda b: (b, 0, 0)),
            # Just the k conv taps, resident in SMEM.
            pl.BlockSpec(memory_space=pltpu.MemorySpace.SMEM),
        ],
        out_specs=pl.BlockSpec((Bt, C, HW), lambda b: (b, 0, 0)),
        compiler_params=pltpu.CompilerParams(
            dimension_semantics=("parallel",),
            vmem_limit_bytes=vmem_limit),
    )(x3, w)

    return out.reshape(B, C, H, W)


# ----------------------------------------------------------------------------
# Pure-JAX reference (mirrors the PyTorch forward), for verification only.
# ----------------------------------------------------------------------------
def channel_attention_ref(x, conv_w):
    B, C, H, W = x.shape
    k = int(conv_w.shape[-1])
    pad = (k - 1) // 2
    y = jnp.mean(x, axis=(2, 3))                                 # (B, C)
    yp = jnp.pad(y, ((0, 0), (pad, pad)))
    w = conv_w.reshape(-1)
    conv = sum(w[t] * yp[:, t:t + C] for t in range(k))          # Conv1d along channels
    s = jax.nn.sigmoid(conv)
    return x * s[:, :, None, None]


# ----------------------------------------------------------------------------
if __name__ == "__main__":
    def eca_kernel_size(channel, b=1, gamma=2):
        ks = int(abs((math.log(channel, 2) + b) / gamma))
        return ks if ks % 2 else ks + 1

    def run_case(seed, B, C, H, W, dtype, tol):
        k = eca_kernel_size(C)
        kx, kw = jax.random.split(jax.random.PRNGKey(seed))
        x = jax.random.normal(kx, (B, C, H, W), jnp.float32)
        conv_w = 0.3 * jax.random.normal(kw, (1, 1, k), jnp.float32)
        x_in = x.astype(dtype)
        out = jax.block_until_ready(jax.jit(channel_attention_pallas)(x_in, conv_w))
        ref = channel_attention_ref(x_in.astype(jnp.float32), conv_w)
        assert out.shape == x.shape and out.dtype == dtype
        err = float(jnp.max(jnp.abs(out.astype(jnp.float32) - ref)))
        if err > tol:
            raise SystemExit(
                f"case (B={B},C={C},H={H},W={W},{dtype}): max abs err {err} > {tol}")

    # 1) Lane-aligned fp32 case (C=128 -> k=5), matches the module's canonical use.
    run_case(0, B=2, C=128, H=16, W=16, dtype=jnp.float32, tol=1e-3)
    # 2) Non-(8,128)-aligned spatial size: exercises the no-pad / no-slice path
    #    (block dims equal the full C / H*W dims).  C=48 -> k=3.
    run_case(0, B=3, C=48, H=10, W=10, dtype=jnp.float32, tol=1e-3)
    # 3) bf16 I/O (fp32 accumulation inside the kernel) — halves HBM bytes.
    run_case(0, B=2, C=128, H=16, W=16, dtype=jnp.bfloat16, tol=3e-2)

    print("KERNEL_OK")
</pallas_src>

<mosaic_0001>
module attributes {stable_mosaic.version = 11 : i64} {
  func.func @channel_attention_kernel(%arg0: i32, %arg1: memref<1x128x256xf32, #tpu.memory_space<vmem>>, %arg2: memref<5xf32, #tpu.memory_space<smem>>, %arg3: memref<1x128x256xf32, #tpu.memory_space<vmem>>) attributes {dimension_semantics = [#tpu.dimension_semantics<parallel>], iteration_bounds = array<i64: 2>, scalar_prefetch = 0 : i64, scratch_operands = 0 : i64, tpu.core_type = #tpu.core_type<tc>, window_params = [{transform_indices = @transform_0, window_bounds = array<i64: 1, 128, 256>}, {transform_indices = @transform_1, window_bounds = array<i64: 5>}, {transform_indices = @transform_2, window_bounds = array<i64: 1, 128, 256>}]} {
    %c0 = arith.constant 0 : index
    %c0_0 = arith.constant 0 : index
    %c0_1 = arith.constant 0 : index
    %0 = vector.load %arg1[%c0, %c0_0, %c0_1] : memref<1x128x256xf32, #tpu.memory_space<vmem>>, vector<1x128x256xf32>
    %cst = arith.constant dense<0.000000e+00> : vector<1x128xf32>
    %1 = vector.multi_reduction <add>, %0, %cst [2] : vector<1x128x256xf32> to vector<1x128xf32>
    %2 = vector.shape_cast %1 : vector<1x128xf32> to vector<1x128x1xf32>
    %cst_2 = arith.constant 3.906250e-03 : f32
    %3 = vector.broadcast %cst_2 : f32 to vector<1x128x1xf32>
    %4 = arith.mulf %2, %3 : vector<1x128x1xf32>
    %5 = tpu.iota {dimensions = array<i32: 1>} : vector<1x128x1xi32>
    %c2 = arith.constant 2 : index
    %6 = memref.load %arg2[%c2] : memref<5xf32, #tpu.memory_space<smem>>
    %7 = vector.broadcast %6 : f32 to vector<1x128x1xf32>
    %8 = arith.mulf %7, %4 : vector<1x128x1xf32>
    %c2_i32 = arith.constant 2 : i32
    %9 = tpu.dynamic_rotate %4 by %c2_i32 dim 1 : vector<1x128x1xf32>, i32 -> vector<1x128x1xf32>
    %c-2_i32 = arith.constant -2 : i32
    %10 = vector.broadcast %c-2_i32 : i32 to vector<1x128x1xi32>
    %11 = arith.addi %5, %10 : vector<1x128x1xi32>
    %c0_i32 = arith.constant 0 : i32
    %12 = vector.broadcast %c0_i32 : i32 to vector<1x128x1xi32>
    %13 = arith.cmpi sge, %11, %12 : vector<1x128x1xi32>
    %c-2_i32_3 = arith.constant -2 : i32
    %14 = vector.broadcast %c-2_i32_3 : i32 to vector<1x128x1xi32>
    %15 = arith.addi %5, %14 : vector<1x128x1xi32>
    %c128_i32 = arith.constant 128 : i32
    %16 = vector.broadcast %c128_i32 : i32 to vector<1x128x1xi32>
    %17 = arith.cmpi slt, %15, %16 : vector<1x128x1xi32>
    %18 = arith.andi %13, %17 : vector<1x128x1xi1>
    %c0_4 = arith.constant 0 : index
    %19 = memref.load %arg2[%c0_4] : memref<5xf32, #tpu.memory_space<smem>>
    %cst_5 = arith.constant 0.000000e+00 : f32
    %20 = vector.broadcast %cst_5 : f32 to vector<1x128x1xf32>
    %21 = arith.select %18, %9, %20 : vector<1x128x1xi1>, vector<1x128x1xf32>
    %22 = vector.broadcast %19 : f32 to vector<1x128x1xf32>
    %23 = arith.mulf %22, %21 : vector<1x128x1xf32>
    %24 = arith.addf %8, %23 : vector<1x128x1xf32>
    %c1_i32 = arith.constant 1 : i32
    %25 = tpu.dynamic_rotate %4 by %c1_i32 dim 1 : vector<1x128x1xf32>, i32 -> vector<1x128x1xf32>
    %c-1_i32 = arith.constant -1 : i32
    %26 = vector.broadcast %c-1_i32 : i32 to vector<1x128x1xi32>
    %27 = arith.addi %5, %26 : vector<1x128x1xi32>
    %c0_i32_6 = arith.constant 0 : i32
    %28 = vector.broadcast %c0_i32_6 : i32 to vector<1x128x1xi32>
    %29 = arith.cmpi sge, %27, %28 : vector<1x128x1xi32>
    %c-1_i32_7 = arith.constant -1 : i32
    %30 = vector.broadcast %c-1_i32_7 : i32 to vector<1x128x1xi32>
    %31 = arith.addi %5, %30 : vector<1x128x1xi32>
    %c128_i32_8 = arith.constant 128 : i32
    %32 = vector.broadcast %c128_i32_8 : i32 to vector<1x128x1xi32>
    %33 = arith.cmpi slt, %31, %32 : vector<1x128x1xi32>
    %34 = arith.andi %29, %33 : vector<1x128x1xi1>
    %c1 = arith.constant 1 : index
    %35 = memref.load %arg2[%c1] : memref<5xf32, #tpu.memory_space<smem>>
    %cst_9 = arith.constant 0.000000e+00 : f32
    %36 = vector.broadcast %cst_9 : f32 to vector<1x128x1xf32>
    %37 = arith.select %34, %25, %36 : vector<1x128x1xi1>, vector<1x128x1xf32>
    %38 = vector.broadcast %35 : f32 to vector<1x128x1xf32>
    %39 = arith.mulf %38, %37 : vector<1x128x1xf32>
    %40 = arith.addf %24, %39 : vector<1x128x1xf32>
    %c127_i32 = arith.constant 127 : i32
    %41 = tpu.dynamic_rotate %4 by %c127_i32 dim 1 : vector<1x128x1xf32>, i32 -> vector<1x128x1xf32>
    %c1_i32_10 = arith.constant 1 : i32
    %42 = vector.broadcast %c1_i32_10 : i32 to vector<1x128x1xi32>
    %43 = arith.addi %5, %42 : vector<1x128x1xi32>
    %c0_i32_11 = arith.constant 0 : i32
    %44 = vector.broadcast %c0_i32_11 : i32 to vector<1x128x1xi32>
    %45 = arith.cmpi sge, %43, %44 : vector<1x128x1xi32>
    %c1_i32_12 = arith.constant 1 : i32
    %46 = vector.broadcast %c1_i32_12 : i32 to vector<1x128x1xi32>
    %47 = arith.addi %5, %46 : vector<1x128x1xi32>
    %c128_i32_13 = arith.constant 128 : i32
    %48 = vector.broadcast %c128_i32_13 : i32 to vector<1x128x1xi32>
    %49 = arith.cmpi slt, %47, %48 : vector<1x128x1xi32>
    %50 = arith.andi %45, %49 : vector<1x128x1xi1>
    %c3 = arith.constant 3 : index
    %51 = memref.load %arg2[%c3] : memref<5xf32, #tpu.memory_space<smem>>
    %cst_14 = arith.constant 0.000000e+00 : f32
    %52 = vector.broadcast %cst_14 : f32 to vector<1x128x1xf32>
    %53 = arith.select %50, %41, %52 : vector<1x128x1xi1>, vector<1x128x1xf32>
    %54 = vector.broadcast %51 : f32 to vector<1x128x1xf32>
    %55 = arith.mulf %54, %53 : vector<1x128x1xf32>
    %56 = arith.addf %40, %55 : vector<1x128x1xf32>
    %c126_i32 = arith.constant 126 : i32
    %57 = tpu.dynamic_rotate %4 by %c126_i32 dim 1 : vector<1x128x1xf32>, i32 -> vector<1x128x1xf32>
    %c2_i32_15 = arith.constant 2 : i32
    %58 = vector.broadcast %c2_i32_15 : i32 to vector<1x128x1xi32>
    %59 = arith.addi %5, %58 : vector<1x128x1xi32>
    %c0_i32_16 = arith.constant 0 : i32
    %60 = vector.broadcast %c0_i32_16 : i32 to vector<1x128x1xi32>
    %61 = arith.cmpi sge, %59, %60 : vector<1x128x1xi32>
    %c2_i32_17 = arith.constant 2 : i32
    %62 = vector.broadcast %c2_i32_17 : i32 to vector<1x128x1xi32>
    %63 = arith.addi %5, %62 : vector<1x128x1xi32>
    %c128_i32_18 = arith.constant 128 : i32
    %64 = vector.broadcast %c128_i32_18 : i32 to vector<1x128x1xi32>
    %65 = arith.cmpi slt, %63, %64 : vector<1x128x1xi32>
    %66 = arith.andi %61, %65 : vector<1x128x1xi1>
    %c4 = arith.constant 4 : index
    %67 = memref.load %arg2[%c4] : memref<5xf32, #tpu.memory_space<smem>>
    %cst_19 = arith.constant 0.000000e+00 : f32
    %68 = vector.broadcast %cst_19 : f32 to vector<1x128x1xf32>
    %69 = arith.select %66, %57, %68 : vector<1x128x1xi1>, vector<1x128x1xf32>
    %70 = vector.broadcast %67 : f32 to vector<1x128x1xf32>
    %71 = arith.mulf %70, %69 : vector<1x128x1xf32>
    %72 = arith.addf %56, %71 : vector<1x128x1xf32>
    %73 = arith.negf %72 : vector<1x128x1xf32>
    %74 = math.exp %73 : vector<1x128x1xf32>
    %cst_20 = arith.constant 1.000000e+00 : f32
    %75 = vector.broadcast %cst_20 : f32 to vector<1x128x1xf32>
    %76 = arith.addf %75, %74 : vector<1x128x1xf32>
    %77 = arith.divf %75, %76 : vector<1x128x1xf32>
    %78 = vector.broadcast %77 : vector<1x128x1xf32> to vector<1x128x256xf32>
    %79 = arith.mulf %0, %78 : vector<1x128x256xf32>
    %c0_21 = arith.constant 0 : index
    %c0_22 = arith.constant 0 : index
    %c0_23 = arith.constant 0 : index
    %80 = vector.load %arg3[%c0_21, %c0_22, %c0_23] : memref<1x128x256xf32, #tpu.memory_space<vmem>>, vector<1x128x256xf32>
    tpu.vector_store %arg3[%c0_21, %c0_22, %c0_23], %79 {strides = array<i32>} : memref<1x128x256xf32, #tpu.memory_space<vmem>>, vector<1x128x256xf32>,
    return
  }
  func.func @transform_0(%arg0: i32) -> (i32, i32, i32) {
    %c0_i32 = arith.constant 0 : i32
    %c0_i32_0 = arith.constant 0 : i32
    %c0_i32_1 = arith.constant 0 : i32
    return %arg0, %c0_i32, %c0_i32_0 : i32, i32, i32
  }
  func.func @transform_1(%arg0: i32) -> i32 {
    %c0_i32 = arith.constant 0 : i32
    %c0_i32_0 = arith.constant 0 : i32
    return %c0_i32 : i32
  }
  func.func @transform_2(%arg0: i32) -> (i32, i32, i32) {
    %c0_i32 = arith.constant 0 : i32
    %c0_i32_0 = arith.constant 0 : i32
    %c0_i32_1 = arith.constant 0 : i32
    return %arg0, %c0_i32, %c0_i32_0 : i32, i32, i32
  }
}

</mosaic_0001>

<bundles_post_ra>
// kernel: channel_attention_pallas.1
= control target key start
LH: loop header
LB: loop body
LE: loop exit
PB: predicated region body
PF: predicated region fallthrough
CT: control target
= control target key end

     0   :  { %7 = vsyncpa [#allocation3], 0  ;;  %s1373_s9 = smov 0   ;;  %s1970_s0 = inlined_call_operand.vmem [shape: f32[2,128,256], index: 0, kind: input, shape index: {}]   ;;  %s1971_s1 = inlined_call_operand.vmem [shape: f32[5], index: 1, kind: input, shape index: {}]   ;;  %s1972_s2 = inlined_call_operand.vmem [shape: f32[2,128,256], index: 2, kind: output, shape index: {}]  }
   0x1 LB: > { %s1184_s10 = sadd.s32 4294967295, %s1354_s9   ;;  %p1186_p0 = scmp.ge.s32.totalorder %s1354_s9, 1  ;;  %s1354_s9 = sphi %s1373_s9, %s13_s9  }
   0x2   : > { %p91_p1 = scmp.lt.s32.totalorder %s1354_s9, 3  ;;  %s104_s13 = sshll.u32 %s1971_s1, 4  ;;  %s105_s13 = int_to_ptr.vmem [resolvable:$true] %s104_s13 }
   0x3   : > { %p1227_p3 = scmp.eq.s32.totalorder %s1184_s10, 0  ;;  %s1329_s15 = scalar_lea.vmem %s105_s13, 16 }
   0x4   : > { %p1384_p2 = pnand %p1186_p0, %p91_p1  ;;  %p1330_p6 = scmp.ne.s32.totalorder %s105_s13, %s1329_s15 }
   0x5   : > { %p1337_p10 = scmp.lt.s32.totalorder %s105_s13, %s105_s13  ;;  %p1338_p11 = scmp.lt.s32.totalorder %s1329_s15, %s1329_s15 }
   0x6   : > { %p1223_p4 = pneg %p1384_p2 }
   0x7   : > { %p1339_p12 = por %p1338_p11, %p1337_p10 }
   0x8   : > { %p1224_p5 = pnand %p1227_p3, %p1223_p4 }
   0xa   : > { %p1331_p7 = pneg %p1224_p5 }
   0xc   : > { %p1332_p8 = pnand %p1331_p7, %p1330_p6 }
   0xe   : > { %p1333_p9 = pneg %p1332_p8 }
  0x10   : > { %p1340_p13 = pnand %p1339_p12, %p1333_p9 }
  0x12   : > { %1343 = shalt.err (!%p1340_p13)
}
  0x13   : > { %s1356_s16 = smov [#allocation2]   ;;  %125 = sbr.rel (%p1384_p2) target bundleno = 433 (0x1b1), region = 28 }
  0x14   : > { %1226 = dma.vmem_to_smem (!%p1224_p5), %s105_s13, 16, %s1356_s16, [#allocation3]  }
  0x1a   : > { %1349 = dma.done.wait (%p1227_p3), [#allocation3], 16  }
  0x1b   : > { %1351 = vsyncadd (%p1227_p3), [#allocation3], 4294967280 }
  0x1c   : > { %131 = sfence }
  0x1d   : > { %p148_p0 = scmp.lt.s32.totalorder %s1184_s10, 1  ;;  %v1357_v48 = vmov 0   ;;  %v254_v49 = vlaneseq  ;;  %s1195_s21 = sld [smem:[#allocation2 + $0x2]] }
  0x1e   : > { %1239 = vset.pattern.permute.xlu1 %v1357_v48  ;;  %1240 = vset.pattern.permute.xlu0 %v1357_v48  ;;  %s386_s22 = sld [smem:[#allocation2]]  ;;  %s1196_s23 = sld [smem:[#allocation2 + $0x1]] }
  0x1f   : > { %s1975_s10 = smov (!%p148_p0, %s1184_s10), 1  ;;  %s1197_s24 = sld [smem:[#allocation2 + $0x3]]  ;;  %v1461_v50 = vshrl.u32 %v254_v49, 7 }
  0x20   : > { %s1217_s17 = sshll.u32 %s1975_s10, 8  ;;  %s1471_s25 = sld [smem:[#allocation2 + $0x4]] }
  0x21   : > { %s1403_s20 = scalar_lea.vmem %s1970_s0, %s1217_s17  ;;  %vm305_vm0 = vcmp.lt.s32.totalorder %v1461_v50, 2  ;;  %vm452_vm1 = vcmp.lt.s32.totalorder %v1461_v50, 1  ;;  %vm599_vm2 = vcmp.lt.s32.totalorder %v1461_v50, 7  ;;  %vm746_vm3 = vcmp.lt.s32.totalorder %v1461_v50, 6  ;;  %s1901_s28 = scalar_lea.vmem %s1972_s2, %s1217_s17 }
  0x22   : > { %v160_v0 = vld [vmem:[%s1403_s20 + $0x10] sm:$0xff]  ;;  %v161_v1 = vld [vmem:[%s1403_s20 + $0x18] sm:$0xff]  ;;  %v158_v2 = vld [vmem:[%s1403_s20] sm:$0xff] }
  0x23   : > { %v193_v3 = vadd.f32 %v161_v1, %v160_v0  ;;  %v159_v4 = vld [vmem:[%s1403_s20 + $0x8] sm:$0xff]  ;;  %v162_v5 = vld [vmem:[%s1403_s20 + $0x20] sm:$0xff]  ;;  %v188_v8 = vld [vmem:[%s1403_s20 + $0xf0] sm:$0xff]  ;;  %v1467_v57 = vstv %s1195_s21 }
  0x24   : > { %v163_v6 = vld [vmem:[%s1403_s20 + $0x28] sm:$0xff]  ;;  %v190_v7 = vadd.f32 %v159_v4, %v158_v2  ;;  %v189_v9 = vld [vmem:[%s1403_s20 + $0xf8] sm:$0xff]  ;;  %v166_v12 = vld [vmem:[%s1403_s20 + $0x40] sm:$0xff]  ;;  %v1469_v58 = vstv %s386_s22  ;;  %v270_v4 = vadd.s32 120, %v1461_v50 }
  0x25   : > { %194 = vadd.xlane.f32.xlu1 %v193_v3  ;;  %v196_v10 = vadd.f32 %v163_v6, %v162_v5  ;;  %v235_v11 = vadd.f32 %v189_v9, %v188_v8  ;;  %v167_v13 = vld [vmem:[%s1403_s20 + $0x48] sm:$0xff]  ;;  %v1416_v14 = vld [vmem:[%s1403_s20 + $0x30] sm:$0xff]  ;;  %v1419_v15 = vld [vmem:[%s1403_s20 + $0x38] sm:$0xff]  ;;  %v1475_v62 = vstv %s1196_s23  ;;  %v322_v8 = vadd.s32 4294967294, %v1461_v50 }
  0x26   : > { %191 = vadd.xlane.f32.xlu0 %v190_v7  ;;  %v202_v16 = vadd.f32 %v167_v13, %v166_v12  ;;  %v199_v17 = vadd.f32 %v1419_v15, %v1416_v14  ;;  %v170_v18 = vld [vmem:[%s1403_s20 + $0x60] sm:$0xff]  ;;  %v171_v19 = vld [vmem:[%s1403_s20 + $0x68] sm:$0xff]  ;;  %v168_v20 = vld [vmem:[%s1403_s20 + $0x50] sm:$0xff]  ;;  %v1478_v63 = vstv %s1197_s24  ;;  %v469_v9 = vadd.s32 4294967295, %v1461_v50 }
  0x27   : > { %v169_v21 = vld [vmem:[%s1403_s20 + $0x58] sm:$0xff]  ;;  %v208_v22 = vadd.f32 %v171_v19, %v170_v18  ;;  %v174_v24 = vld [vmem:[%s1403_s20 + $0x80] sm:$0xff]  ;;  %v175_v25 = vld [vmem:[%s1403_s20 + $0x88] sm:$0xff]  ;;  %vm338_vm4 = vcmp.ge.s32.totalorder %v322_v8, 0 }
  0x28   : > { %v205_v23 = vadd.f32 %v169_v21, %v168_v20  ;;  %v172_v26 = vld [vmem:[%s1403_s20 + $0x70] sm:$0xff]  ;;  %v173_v27 = vld [vmem:[%s1403_s20 + $0x78] sm:$0xff]  ;;  %v214_v28 = vadd.f32 %v175_v25, %v174_v24  ;;  %v178_v30 = vld [vmem:[%s1403_s20 + $0xa0] sm:$0xff]  ;;  %vm485_vm5 = vcmp.ge.s32.totalorder %v469_v9, 0 }
  0x29   : > { %197 = vadd.xlane.f32.xlu1 %v196_v10  ;;  %v211_v29 = vadd.f32 %v173_v27, %v172_v26  ;;  %v179_v31 = vld [vmem:[%s1403_s20 + $0xa8] sm:$0xff]  ;;  %v1434_v32 = vld [vmem:[%s1403_s20 + $0x90] sm:$0xff]  ;;  %v1437_v33 = vld [vmem:[%s1403_s20 + $0x98] sm:$0xff] }
  0x2a   : > { %236 = vadd.xlane.f32.xlu0 %v235_v11  ;;  %v220_v34 = vadd.f32 %v179_v31, %v178_v30  ;;  %v217_v35 = vadd.f32 %v1437_v33, %v1434_v32  ;;  %v182_v36 = vld [vmem:[%s1403_s20 + $0xc0] sm:$0xff]  ;;  %v183_v37 = vld [vmem:[%s1403_s20 + $0xc8] sm:$0xff]  ;;  %v1444_v38 = vld [vmem:[%s1403_s20 + $0xb0] sm:$0xff] }
  0x2b   : > { %v1447_v39 = vld [vmem:[%s1403_s20 + $0xb8] sm:$0xff]  ;;  %v226_v40 = vadd.f32 %v183_v37, %v182_v36  ;;  %v186_v42 = vld [vmem:[%s1403_s20 + $0xe0] sm:$0xff]  ;;  %v187_v43 = vld [vmem:[%s1403_s20 + $0xe8] sm:$0xff] }
  0x2c   : > { %v223_v41 = vadd.f32 %v1447_v39, %v1444_v38  ;;  %v1454_v44 = vld [vmem:[%s1403_s20 + $0xd0] sm:$0xff]  ;;  %v1457_v45 = vld [vmem:[%s1403_s20 + $0xd8] sm:$0xff]  ;;  %v232_v46 = vadd.f32 %v187_v43, %v186_v42 }
  0x2d   : > { %203 = vadd.xlane.f32.xlu1 %v202_v16  ;;  %v229_v47 = vadd.f32 %v1457_v45, %v1454_v44 }
  0x2e   : > { %200 = vadd.xlane.f32.xlu0 %v199_v17 }
  0x31   : > { %209 = vadd.xlane.f32.xlu1 %v208_v22 }
  0x32   : > { %206 = vadd.xlane.f32.xlu0 %v205_v23 }
  0x35   : > { %215 = vadd.xlane.f32.xlu1 %v214_v28  ;;  %v1511_v28 = vstv %s1471_s25 }
  0x36   : > { %212 = vadd.xlane.f32.xlu0 %v211_v29 }
  0x39   : > { %221 = vadd.xlane.f32.xlu1 %v220_v34 }
  0x3a   : > { %218 = vadd.xlane.f32.xlu0 %v217_v35 }
  0x3d   : > { %227 = vadd.xlane.f32.xlu1 %v226_v40 }
  0x3e   : > { %224 = vadd.xlane.f32.xlu0 %v223_v41  ;;  %v631_v41 = vadd.s32 1, %v270_v4 }
  0x40   : > { %vm663_vm6 = vcmp.lt.s32.totalorder %v631_v41, 128 }
  0x41   : > { %233 = vadd.xlane.f32.xlu1 %v232_v46 }
  0x42   : > { %230 = vadd.xlane.f32.xlu0 %v229_v47 }
  0xb2   : > { %v195_v51 = vpop.xlane.xlu1 %194 }
  0xb3   : > { %v239_v52 = vmul.f32 0.00390625, %v195_v51  ;;  %v192_v53 = vpop.xlane.xlu0 %191 }
  0xb4   : > { %v1463_v54 = vmul.f32 0.00390625, %v192_v53  ;;  %v1541_v53 = vadd.s32 2, %v270_v4 }
  0xb5   : > { %v290_v55 = vrot.slane %v239_v52, 6  ;;  %v437_v56 = vrot.slane %v239_v52, 7  ;;  %v274_v6 = vmul.f32 %v1467_v57, %v239_v52  ;;  %v584_v10 = vrot.slane %v239_v52, 1 }
  0xb6   : > { %v289_v59 = vrot.slane %v1463_v54, 6  ;;  %v436_v60 = vrot.slane %v1463_v54, 7  ;;  %v198_v61 = vpop.xlane.xlu1 %197  ;;  %v731_v11 = vrot.slane %v239_v52, 2  ;;  %v583_v12 = vrot.slane %v1463_v54, 1 }
  0xb7   : > { %v1480_v0 = vmul.f32 0.00390625, %v198_v61  ;;  %v237_v1 = vpop.xlane.xlu0 %236  ;;  %v730_v20 = vrot.slane %v1463_v54, 2  ;;  %vm810_vm7 = vcmp.lt.s32.totalorder %v1541_v53, 128 }
  0xb8   : > { %v320_v2 = vsel %vm305_vm0, %v289_v59, %v290_v55  ;;  %v467_v3 = vsel %vm452_vm1, %v436_v60, %v437_v56  ;;  %v1487_v5 = vmul.f32 0.00390625, %v237_v1  ;;  %v614_v37 = vsel %vm599_vm2, %v583_v12, %v584_v10 }
  0xb9   : > { %v405_v7 = vmul.f32 %v1469_v58, %v320_v2  ;;  %v291_v13 = vrot.slane %v1480_v0, 6  ;;  %v552_v17 = vmul.f32 %v1475_v62, %v467_v3  ;;  %v585_v18 = vrot.slane %v1480_v0, 1 }
  0xba   : > { %v732_v19 = vrot.slane %v1480_v0, 2  ;;  %v438_v22 = vrot.slane %v1480_v0, 7  ;;  %v304_v23 = vrot.slane %v1487_v5, 6  ;;  %v451_v27 = vrot.slane %v1487_v5, 7  ;;  %v204_v35 = vpop.xlane.xlu1 %203 }
  0xbb   : > { %v421_v16 = vadd.f32 %v405_v7, %v274_v6  ;;  %v319_v21 = vsel %vm305_vm0, %v290_v55, %v291_v13  ;;  %v613_v26 = vsel %vm599_vm2, %v584_v10, %v585_v18  ;;  %v275_v30 = vmul.f32 %v1467_v57, %v1480_v0  ;;  %v201_v36 = vpop.xlane.xlu0 %200 }
  0xbc   : > { %v406_v25 = vmul.f32 %v1469_v58, %v319_v21  ;;  %v699_v29 = vmul.f32 %v1478_v63, %v613_v26  ;;  %v760_v31 = vsel %vm746_vm3, %v731_v11, %v732_v19  ;;  %v321_v34 = vsel %vm305_vm0, %v304_v23, %v289_v59 }
  0xbd   : > { %v568_v24 = vadd.f32 %v552_v17, %v421_v16  ;;  %v761_v42 = vsel %vm746_vm3, %v730_v20, %v731_v11  ;;  %v466_v46 = vsel %vm452_vm1, %v437_v56, %v438_v22  ;;  %v468_v47 = vsel %vm452_vm1, %v451_v27, %v436_v60 }
  0xbe   : > { %v422_v43 = vadd.f32 %v406_v25, %v275_v30  ;;  %v846_v48 = vmul.f32 %v1511_v28, %v760_v31  ;;  %v387_v49 = vsel %vm338_vm4, %v321_v34, 0.0  ;;  %v1539_v51 = vmul.f32 0.00390625, %v204_v35 }
  0xbf   : > { %v715_v40 = vadd.f32 %v699_v29, %v568_v24  ;;  %v241_v52 = vmul.f32 0.00390625, %v201_v36  ;;  %v553_v55 = vmul.f32 %v1475_v62, %v466_v46  ;;  %v534_v61 = vsel %vm485_vm5, %v468_v47, 0.0  ;;  %v207_v31 = vpop.xlane.xlu0 %206 }
  0xc0   : > { %v273_v56 = vmul.f32 %v1467_v57, %v1463_v54  ;;  %v1547_v1 = vmul.f32 %v1478_v63, %v614_v37  ;;  %v1550_v60 = vmul.f32 %v1511_v28, %v761_v42  ;;  %v404_v2 = vmul.f32 %v1469_v58, %v387_v49  ;;  %v210_v37 = vpop.xlane.xlu1 %209 }
  0xc1   : > { %v862_v59 = vadd.f32 %v846_v48, %v715_v40  ;;  %v569_v3 = vadd.f32 %v553_v55, %v422_v43  ;;  %v598_v4 = vrot.slane %v1487_v5, 1  ;;  %v587_v6 = vrot.slane %v1539_v51, 1 }
  0xc2   : > { %v292_v7 = vrot.slane %v241_v52, 6  ;;  %v551_v8 = vmul.f32 %v1475_v62, %v534_v61  ;;  %v745_v9 = vrot.slane %v1487_v5, 2  ;;  %v439_v10 = vrot.slane %v241_v52, 7 }
  0xc3   : > { %v586_v11 = vrot.slane %v241_v52, 1  ;;  %v1200_v16 = vmul.f32 -1.442695, %v862_v59  ;;  %v293_v17 = vrot.slane %v1539_v51, 6  ;;  %v733_v24 = vrot.slane %v241_v52, 2 }
  0xc4   : > { %v318_v21 = vsel %vm305_vm0, %v291_v13, %v292_v7  ;;  %v734_v25 = vrot.slane %v1539_v51, 2  ;;  %v276_v26 = vmul.f32 %v1467_v57, %v241_v52  ;;  %v465_v30 = vsel %vm452_vm1, %v438_v22, %v439_v10 }
  0xc5   : > { %v407_v29 = vmul.f32 %v1469_v58, %v318_v21  ;;  %v420_v34 = vadd.f32 %v404_v2, %v273_v56  ;;  %v615_v35 = vsel %vm599_vm2, %v598_v4, %v583_v12  ;;  %v440_v13 = vrot.slane %v1539_v51, 7 }
  0xc6   : > { %v611_v36 = vsel %vm599_vm2, %v586_v11, %v587_v6  ;;  %v554_v22 = vmul.f32 %v1475_v62, %v465_v30  ;;  %v612_v42 = vsel %vm599_vm2, %v585_v18, %v586_v11  ;;  %v1581_v43 = vmul.f32 0.00390625, %v210_v37 }
  0xc7   : > { %v423_v40 = vadd.f32 %v407_v29, %v276_v26  ;;  %v317_v12 = vsel %vm305_vm0, %v292_v7, %v293_v17  ;;  %v700_v46 = vmul.f32 %v1478_v63, %v612_v42  ;;  %v759_v47 = vsel %vm746_vm3, %v732_v19, %v733_v24 }
  0xc8   : > { %v1591_v48 = vmul.f32 0.00390625, %v207_v31  ;;  %1241 = vpow2.f32 %v1200_v16  ;;  %v701_v18 = vmul.f32 %v1478_v63, %v611_v36  ;;  %v758_v52 = vsel %vm746_vm3, %v733_v24, %v734_v25 }
  0xc9   : > { %v570_v49 = vadd.f32 %v554_v22, %v423_v40  ;;  %v567_v55 = vadd.f32 %v551_v8, %v420_v34  ;;  %v696_v59 = vsel %vm663_vm6, %v615_v35, 0.0  ;;  %v277_v0 = vmul.f32 %v1467_v57, %v1539_v51 }
  0xca   : > { %v716_v61 = vadd.f32 %v700_v46, %v569_v3  ;;  %v408_v19 = vmul.f32 %v1469_v58, %v317_v12  ;;  %v847_v2 = vmul.f32 %v1511_v28, %v759_v47  ;;  %v295_v7 = vrot.slane %v1581_v43, 6 }
  0xcb   : > { %v717_v56 = vadd.f32 %v701_v18, %v570_v49  ;;  %v464_v11 = vsel %vm452_vm1, %v439_v10, %v440_v13  ;;  %v848_v16 = vmul.f32 %v1511_v28, %v758_v52  ;;  %v294_v8 = vrot.slane %v1591_v48, 6  ;;  %v216_v18 = vpop.xlane.xlu1 %215  ;;  %v213_v52 = vpop.xlane.xlu0 %212 }
  0xcc   : > { %v441_v41 = vrot.slane %v1591_v48, 7  ;;  %v863_v21 = vadd.f32 %v847_v2, %v716_v61  ;;  %v589_v24 = vrot.slane %v1581_v43, 1  ;;  %v278_v3 = vmul.f32 %v1467_v57, %v1591_v48 }
  0xcd   : > { %v588_v26 = vrot.slane %v1591_v48, 1  ;;  %v1615_v29 = vmul.f32 %v1467_v57, %v1487_v5  ;;  %v762_v10 = vsel %vm746_vm3, %v745_v9, %v730_v20  ;;  %v864_v30 = vadd.f32 %v848_v16, %v717_v56 }
  0xce   : > { %v316_v31 = vsel %vm305_vm0, %v293_v17, %v294_v8  ;;  %v442_v34 = vrot.slane %v1581_v43, 7  ;;  %v315_v35 = vsel %vm305_vm0, %v294_v8, %v295_v7  ;;  %v463_v37 = vsel %vm452_vm1, %v440_v13, %v441_v41 }
  0xcf   : > { %v409_v36 = vmul.f32 %v1469_v58, %v316_v31  ;;  %v1632_v54 = vmul.f32 %v1478_v63, %v696_v59  ;;  %v714_v40 = vadd.f32 %v1547_v1, %v567_v55  ;;  %v424_v20 = vadd.f32 %v408_v19, %v277_v0 }
  0xd0   : > { %v555_v22 = vmul.f32 %v1475_v62, %v464_v11  ;;  %v1201_v42 = vmul.f32 -1.442695, %v863_v21  ;;  %v609_v12 = vsel %vm599_vm2, %v588_v26, %v589_v24  ;;  %v610_v13 = vsel %vm599_vm2, %v587_v6, %v588_v26 }
  0xd1   : > { %v425_v17 = vadd.f32 %v409_v36, %v278_v3  ;;  %v1202_v46 = vmul.f32 -1.442695, %v864_v30  ;;  %v279_v47 = vmul.f32 %v1467_v57, %v1581_v43  ;;  %v410_v1 = vmul.f32 %v1469_v58, %v315_v35 }
  0xd2   : > { %v556_v49 = vmul.f32 %v1475_v62, %v463_v37  ;;  %v1242_v55 = vpop.eup %1241  ;;  %v1650_v59 = vsel %vm810_vm7, %v762_v10, 0.0  ;;  %v736_v0 = vrot.slane %v1581_v43, 2  ;;  %v462_v6 = vsel %vm452_vm1, %v441_v41, %v442_v34  ;;  %v222_v37 = vpop.xlane.xlu1 %221 }
  0xd3   : > { %v735_v61 = vrot.slane %v1591_v48, 2  ;;  %v571_v19 = vadd.f32 %v555_v22, %v424_v20  ;;  %v702_v2 = vmul.f32 %v1478_v63, %v610_v13  ;;  %v703_v11 = vmul.f32 %v1478_v63, %v609_v12  ;;  %v219_v13 = vpop.xlane.xlu0 %218 }
  0xd4   : > { %v572_v56 = vadd.f32 %v556_v49, %v425_v17  ;;  %v1659_v16 = vadd.f32 %v1550_v60, %v714_v40  ;;  %1243 = vpow2.f32 %v1201_v42  ;;  %v1661_v53 = vmul.f32 0.00390625, %v216_v18 }
  0xd5   : > { %v245_v8 = vmul.f32 0.00390625, %v213_v52  ;;  %v1663_v21 = vadd.f32 1.0, %v1242_v55  ;;  %1245 = vpow2.f32 %v1202_v46  ;;  %v426_v3 = vadd.f32 %v410_v1, %v279_v47 }
  0xd6   : > { %v557_v41 = vmul.f32 %v1475_v62, %v462_v6  ;;  %v756_v48 = vsel %vm746_vm3, %v735_v61, %v736_v0  ;;  %v757_v26 = vsel %vm746_vm3, %v734_v25, %v735_v61  ;;  %v718_v30 = vadd.f32 %v702_v2, %v571_v19 }
  0xd7   : > { %v296_v60 = vrot.slane %v245_v8, 6  ;;  %v443_v10 = vrot.slane %v245_v8, 7  ;;  %v719_v31 = vadd.f32 %v703_v11, %v572_v56  ;;  %v591_v35 = vrot.slane %v1661_v53, 1 }
  0xd8   : > { %v280_v36 = vmul.f32 %v1467_v57, %v245_v8  ;;  %v297_v40 = vrot.slane %v1661_v53, 6  ;;  %v590_v22 = vrot.slane %v245_v8, 1  ;;  %v737_v42 = vrot.slane %v245_v8, 2 }
  0xd9   : > { %v314_v20 = vsel %vm305_vm0, %v295_v7, %v296_v60  ;;  %v849_v51 = vmul.f32 %v1511_v28, %v757_v26  ;;  %v850_v25 = vmul.f32 %v1511_v28, %v756_v48  ;;  %v461_v12 = vsel %vm452_vm1, %v442_v34, %v443_v10 }
  0xda   : > { %v411_v17 = vmul.f32 %v1469_v58, %v314_v20  ;;  %v573_v46 = vadd.f32 %v557_v41, %v426_v3  ;;  %v444_v47 = vrot.slane %v1661_v53, 7  ;;  %v738_v1 = vrot.slane %v1661_v53, 2  ;;  %v228_v3 = vpop.xlane.xlu1 %227 }
  0xdb   : > { %v558_v49 = vmul.f32 %v1475_v62, %v461_v12  ;;  %v865_v7 = vadd.f32 %v849_v51, %v718_v30  ;;  %v866_v18 = vadd.f32 %v850_v25, %v719_v31  ;;  %v607_v55 = vsel %vm599_vm2, %v590_v22, %v591_v35 }
  0xdc   : > { %v427_v52 = vadd.f32 %v411_v17, %v280_v36  ;;  %v313_v6 = vsel %vm305_vm0, %v296_v60, %v297_v40  ;;  %v608_v34 = vsel %vm599_vm2, %v589_v24, %v590_v22  ;;  %v755_v61 = vsel %vm746_vm3, %v736_v0, %v737_v42 }
  0xdd   : > { %v1697_v19 = vmul.f32 0.00390625, %v219_v13  ;;  %v704_v2 = vmul.f32 %v1478_v63, %v608_v34  ;;  %v705_v11 = vmul.f32 %v1478_v63, %v607_v55  ;;  %v851_v8 = vmul.f32 %v1511_v28, %v755_v61 }
  0xde   : > { %v574_v56 = vadd.f32 %v558_v49, %v427_v52  ;;  %v1244_v41 = vpop.eup %1243  ;;  %v281_v43 = vmul.f32 %v1467_v57, %v1661_v53  ;;  %v754_v24 = vsel %vm746_vm3, %v737_v42, %v738_v1  ;;  %v1708_v0 = vmul.f32 0.00390625, %v222_v37 }
  0xdf   : > { %v1710_v48 = vmul.f32 0.00390625, %v228_v3  ;;  %v1712_v26 = vpop.eup %1245  ;;  %v1203_v60 = vmul.f32 -1.442695, %v865_v7  ;;  %v1204_v30 = vmul.f32 -1.442695, %v866_v18  ;;  %v460_v31 = vsel %vm452_vm1, %v443_v10, %v444_v47  ;;  %v225_v3 = vpop.xlane.xlu0 %224 }
  0xe0   : > { %v720_v36 = vadd.f32 %v704_v2, %v573_v46  ;;  %v412_v20 = vmul.f32 %v1469_v58, %v313_v6  ;;  %v593_v22 = vrot.slane %v1708_v0, 1  ;;  %v298_v51 = vrot.slane %v1697_v19, 6 }
  0xe1   : > { %v445_v42 = vrot.slane %v1697_v19, 7  ;;  %v721_v37 = vadd.f32 %v705_v11, %v574_v56  ;;  %v852_v25 = vmul.f32 %v1511_v28, %v754_v24  ;;  %v282_v12 = vmul.f32 %v1467_v57, %v1697_v19 }
  0xe2   : > { %v867_v17 = vadd.f32 %v851_v8, %v720_v36  ;;  %v299_v13 = vrot.slane %v1708_v0, 6  ;;  %v312_v10 = vsel %vm305_vm0, %v297_v40, %v298_v51  ;;  %v592_v49 = vrot.slane %v1697_v19, 1 }
  0xe3   : > { %v459_v46 = vsel %vm452_vm1, %v444_v47, %v445_v42  ;;  %v446_v7 = vrot.slane %v1708_v0, 7  ;;  %v740_v18 = vrot.slane %v1708_v0, 2  ;;  %v413_v52 = vmul.f32 %v1469_v58, %v312_v10 }
  0xe4   : > { %v739_v55 = vrot.slane %v1697_v19, 2  ;;  %v428_v6 = vadd.f32 %v412_v20, %v281_v43  ;;  %v559_v34 = vmul.f32 %v1475_v62, %v460_v31  ;;  %v560_v61 = vmul.f32 %v1475_v62, %v459_v46 }
  0xe5   : > { %v605_v40 = vsel %vm599_vm2, %v592_v49, %v593_v22  ;;  %1247 = vpow2.f32 %v1203_v60  ;;  %v868_v47 = vadd.f32 %v852_v25, %v721_v37  ;;  %v1205_v56 = vmul.f32 -1.442695, %v867_v17 }
  0xe6   : > { %v429_v2 = vadd.f32 %v413_v52, %v282_v12  ;;  %v1739_v11 = vadd.f32 1.0, %v1244_v41  ;;  %1249 = vpow2.f32 %v1204_v30  ;;  %v283_v19 = vmul.f32 %v1467_v57, %v1708_v0 }
  0xe7   : > { %v707_v8 = vmul.f32 %v1478_v63, %v605_v40  ;;  %v311_v43 = vsel %vm305_vm0, %v298_v51, %v299_v13  ;;  %v458_v24 = vsel %vm452_vm1, %v445_v42, %v446_v7  ;;  %v752_v41 = vsel %vm746_vm3, %v739_v55, %v740_v18  ;;  %v234_v40 = vpop.xlane.xlu1 %233 }
  0xe8   : > { %v576_v31 = vadd.f32 %v560_v61, %v429_v2  ;;  %v575_v60 = vadd.f32 %v559_v34, %v428_v6  ;;  %v606_v30 = vsel %vm599_vm2, %v591_v35, %v592_v49  ;;  %v285_v36 = vmul.f32 %v1467_v57, %v1710_v48  ;;  %v231_v2 = vpop.xlane.xlu0 %230 }
  0xe9   : > { %v301_v20 = vrot.slane %v1710_v48, 6  ;;  %1251 = vpow2.f32 %v1205_v56  ;;  %v1206_v51 = vmul.f32 -1.442695, %v868_v47  ;;  %v249_v37 = vmul.f32 0.00390625, %v225_v3 }
  0xea   : > { %v723_v42 = vadd.f32 %v707_v8, %v576_v31  ;;  %v414_v25 = vmul.f32 %v1469_v58, %v311_v43  ;;  %v561_v17 = vmul.f32 %v1475_v62, %v458_v24  ;;  %v854_v12 = vmul.f32 %v1511_v28, %v752_v41 }
  0xeb   : > { %1253 = vrcp.f32 %v1663_v21  ;;  %v706_v10 = vmul.f32 %v1478_v63, %v606_v30  ;;  %v753_v35 = vsel %vm746_vm3, %v738_v1, %v739_v55  ;;  %v595_v46 = vrot.slane %v1710_v48, 1 }
  0xec   : > { %v300_v49 = vrot.slane %v249_v37, 6  ;;  %v870_v52 = vadd.f32 %v854_v12, %v723_v42  ;;  %v448_v6 = vrot.slane %v1710_v48, 7  ;;  %v284_v34 = vmul.f32 %v1467_v57, %v249_v37 }
  0xed   : > { %v447_v61 = vrot.slane %v249_v37, 7  ;;  %v742_v47 = vrot.slane %v1710_v48, 2  ;;  %v594_v56 = vrot.slane %v249_v37, 1  ;;  %v741_v53 = vrot.slane %v249_v37, 2 }
  0xee   : > { %v310_v21 = vsel %vm305_vm0, %v299_v13, %v300_v49  ;;  %v430_v8 = vadd.f32 %v414_v25, %v283_v19  ;;  %v309_v1 = vsel %vm305_vm0, %v300_v49, %v301_v20  ;;  %v853_v24 = vmul.f32 %v1511_v28, %v753_v35 }
  0xef   : > { %v415_v55 = vmul.f32 %v1469_v58, %v310_v21  ;;  %v457_v3 = vsel %vm452_vm1, %v446_v7, %v447_v61  ;;  %v1248_v43 = vpop.eup %1247  ;;  %v603_v13 = vsel %vm599_vm2, %v594_v56, %v595_v46  ;;  %v1787_v19 = vmul.f32 0.00390625, %v234_v40 }
  0xf0   : > { %v562_v31 = vmul.f32 %v1475_v62, %v457_v3  ;;  %v1789_v41 = vpop.eup %1249  ;;  %v722_v30 = vadd.f32 %v706_v10, %v575_v60  ;;  %v1208_v42 = vmul.f32 -1.442695, %v870_v52  ;;  %v1791_v25 = vmul.f32 0.00390625, %v231_v2 }
  0xf1   : > { %v431_v37 = vadd.f32 %v415_v55, %v284_v34  ;;  %v416_v7 = vmul.f32 %v1469_v58, %v309_v1  ;;  %v456_v12 = vsel %vm452_vm1, %v447_v61, %v448_v6  ;;  %v709_v35 = vmul.f32 %v1478_v63, %v603_v13 }
  0xf2   : > { %v750_v49 = vsel %vm746_vm3, %v741_v53, %v742_v47  ;;  %v1804_v60 = vadd.f32 1.0, %v1712_v26  ;;  %v1806_v10 = vadd.f32 1.0, %v1248_v43  ;;  %1255 = vpow2.f32 %v1206_v51 }
  0xf3   : > { %v578_v52 = vadd.f32 %v562_v31, %v431_v37  ;;  %v1808_v34 = vpop.eup %1251  ;;  %v577_v40 = vadd.f32 %v561_v17, %v430_v8  ;;  %v604_v61 = vsel %vm599_vm2, %v593_v22, %v594_v56  ;;  %v303_v21 = vrot.slane %v1787_v19, 6 }
  0xf4   : > { %v450_v2 = vrot.slane %v1787_v19, 7  ;;  %v869_v55 = vadd.f32 %v853_v24, %v722_v30  ;;  %v563_v26 = vmul.f32 %v1475_v62, %v456_v12  ;;  %v856_v51 = vmul.f32 %v1511_v28, %v750_v49 }
  0xf5   : > { %v1254_v1 = vpop.eup %1253  ;;  %v725_v3 = vadd.f32 %v709_v35, %v578_v52  ;;  %1257 = vpow2.f32 %v1208_v42  ;;  %v432_v43 = vadd.f32 %v416_v7, %v285_v36  ;;  %v306_v17 = vsel %vm305_vm0, %v303_v21, %v304_v23 }
  0xf6   : > { %v302_v22 = vrot.slane %v1791_v25, 6  ;;  %980 = vperm.xlu1 %1239, %v1254_v1   ;;  %v708_v56 = vmul.f32 %v1478_v63, %v604_v61  ;;  %v419_v24 = vmul.f32 %v1469_v58, %v306_v17  ;;  %v453_v31 = vsel %vm452_vm1, %v450_v2, %v451_v27 }
  0xf7   : > { %v872_v8 = vadd.f32 %v856_v51, %v725_v3  ;;  %v751_v36 = vsel %vm746_vm3, %v740_v18, %v741_v53  ;;  %v286_v23 = vmul.f32 %v1467_v57, %v1791_v25  ;;  %v1207_v42 = vmul.f32 -1.442695, %v869_v55 }
  0xf8   : > { %v307_v13 = vsel %vm305_vm0, %v302_v22, %v303_v21  ;;  %v308_v30 = vsel %vm305_vm0, %v301_v20, %v302_v22  ;;  %v287_v27 = vmul.f32 %v1467_v57, %v1787_v19  ;;  %v435_v0 = vadd.f32 %v419_v24, %v1615_v29 }
  0xf9   : > { %v1210_v37 = vmul.f32 -1.442695, %v872_v8  ;;  %v566_v18 = vmul.f32 %v1475_v62, %v453_v31  ;;  %v417_v53 = vmul.f32 %v1469_v58, %v308_v30  ;;  %v418_v7 = vmul.f32 %v1469_v58, %v307_v13 }
  0xfa   : > { %v449_v12 = vrot.slane %v1791_v25, 7  ;;  %v579_v35 = vadd.f32 %v563_v26, %v432_v43  ;;  %v855_v49 = vmul.f32 %v1511_v28, %v751_v36  ;;  %v597_v20 = vrot.slane %v1787_v19, 1 }
  0xfb   : > { %v596_v52 = vrot.slane %v1791_v25, 1  ;;  %v724_v61 = vadd.f32 %v708_v56, %v577_v40  ;;  %1259 = vpow2.f32 %v1210_v37  ;;  %v582_v57 = vadd.f32 %v566_v18, %v435_v0 }
  0xfc   : > { %v433_v21 = vadd.f32 %v417_v53, %v286_v23  ;;  %v1256_v29 = vpop.eup %1255  ;;  %v434_v1 = vadd.f32 %v418_v7, %v287_v27  ;;  %v454_v55 = vsel %vm452_vm1, %v449_v12, %v450_v2  ;;  %v455_v58 = vsel %vm452_vm1, %v448_v6, %v449_v12 }
  0xfd   : > { %v601_v26 = vsel %vm599_vm2, %v596_v52, %v597_v20  ;;  %v564_v3 = vmul.f32 %v1475_v62, %v455_v58  ;;  %v565_v40 = vmul.f32 %v1475_v62, %v454_v55  ;;  %v602_v51 = vsel %vm599_vm2, %v595_v46, %v596_v52 }
  0xfe   : > { %v711_v43 = vmul.f32 %v1478_v63, %v601_v26  ;;  %v744_v2 = vrot.slane %v1787_v19, 2  ;;  %v710_v17 = vmul.f32 %v1478_v63, %v602_v51  ;;  %v743_v6 = vrot.slane %v1791_v25, 2 }
  0xff   : > { %1261 = vrcp.f32 %v1739_v11  ;;  %v1258_v22 = vpop.eup %1257  ;;  %v871_v56 = vadd.f32 %v855_v49, %v724_v61  ;;  %v600_v62 = vsel %vm599_vm2, %v597_v20, %v598_v4  ;;  %v729_v8 = vadd.f32 %v1632_v54, %v582_v57 }
 0x100   : > { %v580_v46 = vadd.f32 %v564_v3, %v433_v21  ;;  %v581_v24 = vadd.f32 %v565_v40, %v434_v1  ;;  %v748_v19 = vsel %vm746_vm3, %v743_v6, %v744_v2  ;;  %v749_v25 = vsel %vm746_vm3, %v742_v47, %v743_v6 }
 0x101   : > { %1263 = vrcp.f32 %v1804_v60  ;;  %v726_v11 = vadd.f32 %v710_v17, %v579_v35  ;;  %v857_v36 = vmul.f32 %v1511_v28, %v749_v25  ;;  %v858_v4 = vmul.f32 %v1511_v28, %v748_v19  ;;  %v1305_v25 = vld [vmem:[%s1403_s20 + $0x10] sm:$0xff] }
 0x102   : > { %v727_v31 = vadd.f32 %v711_v43, %v580_v46  ;;  %v860_v54 = vmul.f32 %v1511_v28, %v1650_v59  ;;  %v934_v23 = vadd.f32 1.0, %v1258_v22  ;;  %v1199_v13 = vmul.f32 -1.442695, %v1659_v16 }
 0x103   : > { %v712_v30 = vmul.f32 %v1478_v63, %v600_v62  ;;  %1265 = vpow2.f32 %v1207_v42  ;;  %v1209_v37 = vmul.f32 -1.442695, %v871_v56  ;;  %v747_v47 = vsel %vm746_vm3, %v744_v2, %v745_v9 }
 0x104   : > { %v874_v48 = vadd.f32 %v858_v4, %v727_v31  ;;  %v876_v60 = vadd.f32 %v860_v54, %v729_v8  ;;  %v873_v18 = vadd.f32 %v857_v36, %v726_v11  ;;  %1267 = vrcp.f32 %v1806_v10  ;;  %v1306_v31 = vld [vmem:[%s1403_s20 + $0x18] sm:$0xff]  ;;  %v1307_v54 = vld [vmem:[%s1403_s20 + $0x20] sm:$0xff] }
 0x105   : > { %v1260_v27 = vpop.eup %1259  ;;  %v728_v0 = vadd.f32 %v712_v30, %v581_v24  ;;  %v930_v59 = vadd.f32 1.0, %v1789_v41  ;;  %1269 = vrcp.f32 %v934_v23  ;;  %v859_v16 = vmul.f32 %v1511_v28, %v747_v47 }
 0x106   : > { %v1212_v53 = vmul.f32 -1.442695, %v874_v48  ;;  %1271 = vpow2.f32 %v1199_v13  ;;  %v936_v63 = vadd.f32 1.0, %v1260_v27  ;;  %v1214_v7 = vmul.f32 -1.442695, %v876_v60  ;;  %v1308_v13 = vld [vmem:[%s1403_s20 + $0x28] sm:$0xff] }
 0x107   : > { %v875_v50 = vadd.f32 %v859_v16, %v728_v0  ;;  %v1211_v5 = vmul.f32 -1.442695, %v873_v18  ;;  %v931_v12 = vadd.f32 1.0, %v1808_v34  ;;  %v932_v35 = vadd.f32 1.0, %v1256_v29  ;;  %v1309_v0 = vld [vmem:[%s1403_s20 + $0x40] sm:$0xff] }
 0x108   : > { %1273 = vpow2.f32 %v1212_v53  ;;  %v1310_v53 = vld [vmem:[%s1403_s20 + $0x48] sm:$0xff] }
 0x109   : > { %v1262_v42 = vpop.eup %1261  ;;  %1275 = vpow2.f32 %v1209_v37  ;;  %v1213_v41 = vmul.f32 -1.442695, %v875_v50 }
 0x10a   : > { %985 = vperm.xlu1 %1239, %v1262_v42   ;;  %1277 = vrcp.f32 %v930_v59 }
 0x10b   : > { %v1264_v9 = vpop.eup %1263  ;;  %1279 = vrcp.f32 %v936_v63 }
 0x10c   : > { %1281 = vpow2.f32 %v1214_v7  ;;  %v1312_v7 = vld [vmem:[%s1403_s20 + $0x58] sm:$0xff] }
 0x10d   : > { %1283 = vpow2.f32 %v1211_v5  ;;  %v1266_v10 = vpop.eup %1265 }
 0x10e   : > { %990 = vperm.xlu1 %1239, %v1264_v9   ;;  %1285 = vrcp.f32 %v931_v12  ;;  %v1268_v28 = vpop.eup %1267  ;;  %v933_v61 = vadd.f32 1.0, %v1266_v10  ;;  %v1313_v12 = vld [vmem:[%s1403_s20 + $0x60] sm:$0xff]  ;;  %v1314_v10 = vld [vmem:[%s1403_s20 + $0x68] sm:$0xff] }
 0x10f   : > { %v1270_v49 = vpop.eup %1269  ;;  %1287 = vpow2.f32 %v1213_v41 }
 0x110   : > { %v1272_v20 = vpop.eup %1271  ;;  %1020 = vperm.xlu0 %1240, %v1270_v49   ;;  %1289 = vrcp.f32 %v932_v35  ;;  %v1316_v49 = vld [vmem:[%s1403_s20 + $0x78] sm:$0xff] }
 0x111   : > { %v925_v55 = vadd.f32 1.0, %v1272_v20 }
 0x112   : > { %995 = vperm.xlu1 %1239, %v1268_v28   ;;  %v1274_v52 = vpop.eup %1273  ;;  %v1315_v28 = vld [vmem:[%s1403_s20 + $0x70] sm:$0xff] }
 0x113   : > { %v1276_v57 = vpop.eup %1275  ;;  %v938_v34 = vadd.f32 1.0, %v1274_v52 }
 0x114   : > { %v1278_v21 = vpop.eup %1277  ;;  %v935_v26 = vadd.f32 1.0, %v1276_v57 }
 0x115   : > { %v1280_v1 = vpop.eup %1279  ;;  %1291 = vrcp.f32 %v938_v34 }
 0x116   : > { %1000 = vperm.xlu1 %1239, %v1278_v21   ;;  %v1282_v58 = vpop.eup %1281  ;;  %1030 = vperm.xlu0 %1240, %v1280_v1   ;;  %1293 = vrcp.f32 %v933_v61  ;;  %v1317_v21 = vld [vmem:[%s1403_s20 + $0x80] sm:$0xff] }
 0x117   : > { %v1284_v29 = vpop.eup %1283  ;;  %1295 = vrcp.f32 %v925_v55  ;;  %v940_v40 = vadd.f32 1.0, %v1282_v58  ;;  %v1318_v55 = vld [vmem:[%s1403_s20 + $0x88] sm:$0xff] }
 0x118   : > { %v1286_v3 = vpop.eup %1285  ;;  %v937_v51 = vadd.f32 1.0, %v1284_v29  ;;  %1297 = vrcp.f32 %v935_v26 }
 0x119   : > { %v1288_v43 = vpop.eup %1287  ;;  %1299 = vrcp.f32 %v940_v40 }
 0x11a   : > { %1005 = vperm.xlu1 %1239, %v1286_v3   ;;  %v1290_v2 = vpop.eup %1289  ;;  %1301 = vrcp.f32 %v937_v51  ;;  %v939_v17 = vadd.f32 1.0, %v1288_v43  ;;  %v1321_v51 = vld [vmem:[%s1403_s20 + $0xa0] sm:$0xff] }
 0x11c   : > { %1303 = vrcp.f32 %v939_v17 }
 0x11e   : > { %1010 = vperm.xlu1 %1239, %v1290_v2   ;;  %v1322_v2 = vld [vmem:[%s1403_s20 + $0xa8] sm:$0xff] }
 0x11f   : > { %v1292_v6 = vpop.eup %1291 }
 0x120   : > { %v1294_v22 = vpop.eup %1293  ;;  %1040 = vperm.xlu0 %1240, %v1292_v6  }
 0x121   : > { %v1296_v56 = vpop.eup %1295 }
 0x122   : > { %1015 = vperm.xlu1 %1239, %v1294_v22   ;;  %v1298_v62 = vpop.eup %1297 }
 0x123   : > { %v1300_v8 = vpop.eup %1299 }
 0x124   : > { %975 = vperm.xlu0 %1240, %v1296_v56   ;;  %v1302_v46 = vpop.eup %1301  ;;  %v1323_v56 = vld [vmem:[%s1403_s20 + $0xf0] sm:$0xff] }
 0x126   : > { %1025 = vperm.xlu1 %1239, %v1298_v62   ;;  %v1304_v24 = vpop.eup %1303 }
 0x128   : > { %1050 = vperm.xlu0 %1240, %v1300_v8   ;;  %v1324_v8 = vld [vmem:[%s1403_s20 + $0xf8] sm:$0xff] }
 0x12a   : > { %1035 = vperm.xlu1 %1239, %v1302_v46  }
 0x12e   : > { %1045 = vperm.xlu1 %1239, %v1304_v24   ;;  %v1325_v24 = vld [vmem:[%s1403_s20 + $0xc0] sm:$0xff] }
 0x175   : > { %v981_v19 = vpop.permute.xlu1 %980 }
 0x176   : > { %v1055_v11 = vmul.f32 %v1305_v25, %v981_v19  ;;  %v1056_v36 = vmul.f32 %v1306_v31, %v981_v19  ;;  %v1326_v25 = vld [vmem:[%s1403_s20 + $0xc8] sm:$0xff] }
 0x178   : > { %1087 = vst [vmem:[%s1901_s28 + $0x10] sm:$0xff] %v1055_v11  ;;  %1088 = vst [vmem:[%s1901_s28 + $0x18] sm:$0xff] %v1056_v36  ;;  %v1327_v36 = vld [vmem:[%s1403_s20 + $0xe0] sm:$0xff] }
 0x189   : > { %v986_v4 = vpop.permute.xlu1 %985 }
 0x18a   : > { %v1057_v23 = vmul.f32 %v1307_v54, %v986_v4  ;;  %v1058_v30 = vmul.f32 %v1308_v13, %v986_v4  ;;  %v1328_v54 = vld [vmem:[%s1403_s20 + $0xe8] sm:$0xff] }
 0x18c   : > { %1089 = vst [vmem:[%s1901_s28 + $0x20] sm:$0xff] %v1057_v23  ;;  %1090 = vst [vmem:[%s1901_s28 + $0x28] sm:$0xff] %v1058_v30 }
 0x18d   : > { %v991_v48 = vpop.permute.xlu1 %990 }
 0x18e   : > { %v1059_v37 = vmul.f32 %v991_v48, %v1416_v14  ;;  %v1060_v47 = vmul.f32 %v991_v48, %v1419_v15  ;;  %v1311_v15 = vld [vmem:[%s1403_s20 + $0x50] sm:$0xff] }
 0x18f   : > { %v1021_v27 = vpop.permute.xlu0 %1020 }
 0x190   : > { %1091 = vst [vmem:[%s1901_s28 + $0x30] sm:$0xff] %v1059_v37  ;;  %1092 = vst [vmem:[%s1901_s28 + $0x38] sm:$0xff] %v1060_v47  ;;  %v1071_v63 = vmul.f32 %v1021_v27, %v1434_v32  ;;  %v1072_v16 = vmul.f32 %v1021_v27, %v1437_v33 }
 0x191   : > { %v996_v60 = vpop.permute.xlu1 %995 }
 0x192   : > { %v1061_v18 = vmul.f32 %v1309_v0, %v996_v60  ;;  %v1062_v59 = vmul.f32 %v1310_v53, %v996_v60  ;;  %1103 = vst [vmem:[%s1901_s28 + $0x90] sm:$0xff] %v1071_v63  ;;  %1104 = vst [vmem:[%s1901_s28 + $0x98] sm:$0xff] %v1072_v16 }
 0x194   : > { %1093 = vst [vmem:[%s1901_s28 + $0x40] sm:$0xff] %v1061_v18  ;;  %1094 = vst [vmem:[%s1901_s28 + $0x48] sm:$0xff] %v1062_v59 }
 0x195   : > { %v1001_v14 = vpop.permute.xlu1 %1000  ;;  %v1031_v5 = vpop.permute.xlu0 %1030 }
 0x196   : > { %v1063_v42 = vmul.f32 %v1311_v15, %v1001_v14  ;;  %v1064_v50 = vmul.f32 %v1312_v7, %v1001_v14  ;;  %v1075_v32 = vmul.f32 %v1031_v5, %v1444_v38  ;;  %v1076_v33 = vmul.f32 %v1031_v5, %v1447_v39 }
 0x198   : > { %1095 = vst [vmem:[%s1901_s28 + $0x50] sm:$0xff] %v1063_v42  ;;  %1096 = vst [vmem:[%s1901_s28 + $0x58] sm:$0xff] %v1064_v50 }
 0x199   : > { %v1006_v9 = vpop.permute.xlu1 %1005  ;;  %1107 = vst [vmem:[%s1901_s28 + $0xb0] sm:$0xff] %v1075_v32  ;;  %1108 = vst [vmem:[%s1901_s28 + $0xb8] sm:$0xff] %v1076_v33 }
 0x19a   : > { %v1065_v41 = vmul.f32 %v1313_v12, %v1006_v9  ;;  %v1066_v35 = vmul.f32 %v1314_v10, %v1006_v9 }
 0x19c   : > { %1097 = vst [vmem:[%s1901_s28 + $0x60] sm:$0xff] %v1065_v41  ;;  %1098 = vst [vmem:[%s1901_s28 + $0x68] sm:$0xff] %v1066_v35 }
 0x19d   : > { %v1011_v38 = vpop.permute.xlu1 %1010 }
 0x19e   : > { %v1067_v39 = vmul.f32 %v1315_v28, %v1011_v38  ;;  %v1068_v20 = vmul.f32 %v1316_v49, %v1011_v38 }
 0x19f   : > { %v1041_v52 = vpop.permute.xlu0 %1040 }
 0x1a0   : > { %1099 = vst [vmem:[%s1901_s28 + $0x70] sm:$0xff] %v1067_v39  ;;  %1100 = vst [vmem:[%s1901_s28 + $0x78] sm:$0xff] %v1068_v20  ;;  %v1079_v57 = vmul.f32 %v1041_v52, %v1454_v44  ;;  %v1080_v34 = vmul.f32 %v1041_v52, %v1457_v45  ;;  %v1319_v44 = vld [vmem:[%s1403_s20] sm:$0xff]  ;;  %v1320_v45 = vld [vmem:[%s1403_s20 + $0x8] sm:$0xff] }
 0x1a1   : > { %v1016_v61 = vpop.permute.xlu1 %1015 }
 0x1a2   : > { %v1069_v1 = vmul.f32 %v1317_v21, %v1016_v61  ;;  %v1070_v58 = vmul.f32 %v1318_v55, %v1016_v61  ;;  %1111 = vst [vmem:[%s1901_s28 + $0xd0] sm:$0xff] %v1079_v57  ;;  %1112 = vst [vmem:[%s1901_s28 + $0xd8] sm:$0xff] %v1080_v34 }
 0x1a3   : > { %v976_v26 = vpop.permute.xlu0 %975 }
 0x1a4   : > { %1101 = vst [vmem:[%s1901_s28 + $0x80] sm:$0xff] %v1069_v1  ;;  %1102 = vst [vmem:[%s1901_s28 + $0x88] sm:$0xff] %v1070_v58  ;;  %v1053_v3 = vmul.f32 %v1319_v44, %v976_v26  ;;  %v1054_v40 = vmul.f32 %v1320_v45, %v976_v26 }
 0x1a5   : > { %v1026_v29 = vpop.permute.xlu1 %1025 }
 0x1a6   : > { %v1073_v43 = vmul.f32 %v1321_v51, %v1026_v29  ;;  %v1074_v17 = vmul.f32 %v1322_v2, %v1026_v29  ;;  %1085 = vst [vmem:[%s1901_s28] sm:$0xff] %v1053_v3  ;;  %1086 = vst [vmem:[%s1901_s28 + $0x8] sm:$0xff] %v1054_v40 }
 0x1a7   : > { %v1051_v6 = vpop.permute.xlu0 %1050 }
 0x1a8   : > { %1105 = vst [vmem:[%s1901_s28 + $0xa0] sm:$0xff] %v1073_v43  ;;  %1106 = vst [vmem:[%s1901_s28 + $0xa8] sm:$0xff] %v1074_v17  ;;  %v1083_v62 = vmul.f32 %v1323_v56, %v1051_v6  ;;  %v1084_v46 = vmul.f32 %v1324_v8, %v1051_v6 }
 0x1a9   : > { %v1036_v22 = vpop.permute.xlu1 %1035 }
 0x1aa   : > { %v1077_v19 = vmul.f32 %v1325_v24, %v1036_v22  ;;  %v1078_v11 = vmul.f32 %v1326_v25, %v1036_v22  ;;  %1115 = vst [vmem:[%s1901_s28 + $0xf0] sm:$0xff] %v1083_v62  ;;  %1116 = vst [vmem:[%s1901_s28 + $0xf8] sm:$0xff] %v1084_v46 }
 0x1ac   : > { %1109 = vst [vmem:[%s1901_s28 + $0xc0] sm:$0xff] %v1077_v19  ;;  %1110 = vst [vmem:[%s1901_s28 + $0xc8] sm:$0xff] %v1078_v11 }
 0x1ad   : > { %v1046_v31 = vpop.permute.xlu1 %1045 }
 0x1ae   : > { %v1081_v4 = vmul.f32 %v1327_v36, %v1046_v31  ;;  %v1082_v23 = vmul.f32 %v1328_v54, %v1046_v31 }
 0x1b0   : > { %1113 = vst [vmem:[%s1901_s28 + $0xe0] sm:$0xff] %v1081_v4  ;;  %1114 = vst [vmem:[%s1901_s28 + $0xe8] sm:$0xff] %v1082_v23 }
 0x1b1 PF: > { %s13_s9 = sadd.s32 1, %s1354_s9  }
 0x1b2   : > { %p10_p1 = scmp.ge.s32.totalorder %s13_s9, 4  }
 0x1b4   :  { %12 = sbr.rel (!%p10_p1) target bundleno = 1 (0x1), region = 63 }
 0x1bb   :  { %1138 = vsyncpa [#allocation3], 1 }
 0x1bc   :  { %1140 = vsyncpa [#allocation3 + $0x1], 1 }

</bundles_post_ra>
